<compile_context>
chip_gen: v7x
topology: tpu7x:2x2x1
jax: 0.10.0
libtpu: 0.0.40
codegen_flags: <defaults>
</compile_context>

<pallas_src>
import functools

import jax
import jax.numpy as jnp
from jax import lax
from jax.experimental import pallas as pl
from jax.experimental.pallas import tpu as pltpu

FREQ_MASK_PARAM = 20
FREQ_STRIPES = 2


def _mel_aug_kernel(starts_ref, ends_ref, x_ref, o_ref, *, bc, group):
    # starts_ref / ends_ref: SMEM int32, shape (FREQ_STRIPES * bc,)
    # x_ref / o_ref: VMEM tiles of shape (group, F, tT)
    g = pl.program_id(0)
    Fdim = x_ref.shape[1]

    # Lane-narrow frequency index: comparisons and the band mask live on
    # (F, 1) (one element per sublane); a single broadcast vsel then covers
    # the whole (F, tT) tile.  The mask does not depend on the T tile index,
    # so T-tiled grid steps reuse exactly the same column.
    fi = lax.broadcasted_iota(jnp.int32, (Fdim, 1), 0)

    for j in range(group):                       # static unroll (group <= 8)
        # Clamp so a ragged last bc-block never reads SMEM out of bounds;
        # its out-of-range VMEM writes are masked by Pallas anyway.
        ch = jnp.minimum(g * group + j, bc - 1)  # fused (b, c) channel index
        band = jnp.zeros((Fdim, 1), dtype=jnp.bool_)
        for s in range(FREQ_STRIPES):            # static unroll over stripes
            st = starts_ref[s * bc + ch]
            en = ends_ref[s * bc + ch]
            band = band | ((fi >= st) & (fi < en))
        xj = x_ref[j]
        # Select, NOT multiply: masked rows become exactly 0 even when x holds
        # -inf / NaN (log-mel), and no -0.0 for negative values.
        o_ref[j] = jnp.where(band, 0, xj)


def _choose_tiling(bc, F, T, itemsize,
                   target_block_bytes=1 << 20,   # ~1 MiB blocks: ~85% of HBM
                                                 # roofline; 4-buffer footprint
                                                 # ~4 MiB << v7x 64 MiB VMEM
                   max_group=8,                  # static-unroll / vreg cap
                   min_grid_steps=8):            # >= 4 steps per TC on v7x
    """Pick (channels-per-block, T-tile).  The grid-length floor is the
    primary constraint (pipeline overlap + v7x megacore sharding); the block
    byte target is the secondary one."""
    chan_block_bytes = F * T * itemsize

    # Time-axis tiling when a single channel alone exceeds the block target.
    if chan_block_bytes > target_block_bytes and T > 128:
        tT = (target_block_bytes // (F * itemsize)) // 128 * 128
        tT = min(max(tT, 128), T)
    else:
        tT = T
    chan_block_bytes = F * tT * itemsize

    group = max(1, min(bc, max_group,
                       target_block_bytes // max(1, chan_block_bytes)))

    def n_steps(g, t):
        return pl.cdiv(bc, g) * pl.cdiv(T, t)

    # Enforce the grid-length floor: first shrink the channel group, then
    # (if bc alone can't provide enough steps) shrink the T tile in
    # lane-dense multiples of 128.
    while group > 1 and n_steps(group, tT) < min_grid_steps:
        group -= 1
    while tT > 128 and n_steps(group, tT) < min_grid_steps:
        tT = max(128, (tT // 2) // 128 * 128)

    return group, tT


def mel_augment(x, starts, ends):
    """Apply FREQ_STRIPES iid frequency masks (the p=1.0 path of MelAugment).

    x:      (B, C, F, T) float mel spectrogram
    starts: (FREQ_STRIPES, B, C) int32 mask start indices
    ends:   (FREQ_STRIPES, B, C) int32 mask end indices (exclusive)
    """
    B, C, F, T = x.shape
    bc = B * C
    xf = x.reshape(bc, F, T)
    starts_f = starts.reshape(-1).astype(jnp.int32)
    ends_f = ends.reshape(-1).astype(jnp.int32)

    group, tT = _choose_tiling(bc, F, T, x.dtype.itemsize)
    grid = (pl.cdiv(bc, group), pl.cdiv(T, tT))

    kernel = functools.partial(_mel_aug_kernel, bc=bc, group=group)

    grid_spec = pltpu.PrefetchScalarGridSpec(
        num_scalar_prefetch=2,
        grid=grid,
        in_specs=[
            pl.BlockSpec((group, F, tT), lambda g, t, st, en: (g, 0, t)),
        ],
        out_specs=pl.BlockSpec((group, F, tT), lambda g, t, st, en: (g, 0, t)),
    )

    # in + out, each double-buffered => 4 block buffers; derive the scoped
    # VMEM request from the real block size instead of hard-coding 32 MiB.
    block_bytes = group * F * tT * x.dtype.itemsize
    vmem_limit = min(int(4.5 * block_bytes) + (4 << 20), 32 << 20)

    nbytes = xf.size * x.dtype.itemsize
    out = pl.pallas_call(
        kernel,
        out_shape=jax.ShapeDtypeStruct(xf.shape, x.dtype),
        grid_spec=grid_spec,
        compiler_params=pltpu.CompilerParams(
            dimension_semantics=("parallel", "parallel"),
            vmem_limit_bytes=vmem_limit,
        ),
        cost_estimate=pl.CostEstimate(
            flops=xf.size, transcendentals=0, bytes_accessed=2 * nbytes
        ),
    )(starts_f, ends_f, xf)
    return out.reshape(B, C, F, T)


def sample_mask_bounds(key, B, C, F):
    """Mimics torchaudio.functional.mask_along_axis_iid sampling:
       value     = U(0, mask_param)
       min_value = U(0, F - value)
       start = floor(min_value), end = floor(min_value + value)
    """
    starts, ends = [], []
    for _ in range(FREQ_STRIPES):
        key, k1, k2 = jax.random.split(key, 3)
        value = jax.random.uniform(k1, (B, C)) * FREQ_MASK_PARAM
        min_value = jax.random.uniform(k2, (B, C)) * (F - value)
        starts.append(jnp.floor(min_value).astype(jnp.int32))
        ends.append(jnp.floor(min_value + value).astype(jnp.int32))
    return jnp.stack(starts, 0), jnp.stack(ends, 0), key


def _reference(x, starts, ends):
    F = x.shape[2]
    fidx = jnp.arange(F)[None, None, :, None]           # (1,1,F,1)
    out = x
    for s in range(FREQ_STRIPES):
        st = starts[s][:, :, None, None]
        en = ends[s][:, :, None, None]
        out = jnp.where((fidx >= st) & (fidx < en), 0.0, out)
    return out


if __name__ == "__main__":
    key = jax.random.PRNGKey(0)

    # Case 1: canonical small mel shape (B, C, F=64 mel bins, T=128 frames).
    B, C, F, T = 2, 4, 64, 128
    key, kx = jax.random.split(key)
    x = jax.random.normal(kx, (B, C, F, T), dtype=jnp.float32)
    # log-mel-style pathological values: masked rows must still come out 0.
    x = x.at[0, 0, 0, :].set(-jnp.inf)
    x = x.at[1, 2, 10, :].set(-1e30)
    starts, ends, key = sample_mask_bounds(key, B, C, F)   # p=1.0: always apply
    out = jax.block_until_ready(mel_augment(x, starts, ends))
    ref = _reference(x, starts, ends)
    assert out.shape == x.shape and out.dtype == x.dtype
    assert jnp.array_equal(out, ref), "mismatch vs reference (case 1)"

    # Case 2: exercises the T-tiled (ragged last T block) path.
    B2, C2, F2, T2 = 1, 5, 64, 640
    key, kx2 = jax.random.split(key)
    x2 = jax.random.normal(kx2, (B2, C2, F2, T2), dtype=jnp.float32)
    starts2, ends2, key = sample_mask_bounds(key, B2, C2, F2)
    out2 = jax.block_until_ready(mel_augment(x2, starts2, ends2))
    ref2 = _reference(x2, starts2, ends2)
    assert jnp.array_equal(out2, ref2), "mismatch vs reference (case 2)"

    print("KERNEL_OK")
</pallas_src>

<mosaic_0001>
module attributes {stable_mosaic.version = 11 : i64} {
  func.func @_mel_aug_kernel(%arg0: i32, %arg1: i32, %arg2: memref<16xi32, #tpu.memory_space<smem>>, %arg3: memref<16xi32, #tpu.memory_space<smem>>, %arg4: memref<1x64x128xf32, #tpu.memory_space<vmem>>, %arg5: memref<1x64x128xf32, #tpu.memory_space<vmem>>) attributes {dimension_semantics = [#tpu.dimension_semantics<parallel>, #tpu.dimension_semantics<parallel>], iteration_bounds = array<i64: 8, 1>, scalar_prefetch = 2 : i64, scratch_operands = 0 : i64, tpu.core_type = #tpu.core_type<tc>, window_params = [{transform_indices = @transform_0, window_bounds = array<i64: 1, 64, 128>}, {transform_indices = @transform_1, window_bounds = array<i64: 1, 64, 128>}]} {
    %0 = tpu.iota {dimensions = array<i32: 0>} : vector<64x1xi32>
    %c1_i32 = arith.constant 1 : i32
    %1 = arith.muli %arg0, %c1_i32 : i32
    %c0_i32 = arith.constant 0 : i32
    %2 = arith.addi %1, %c0_i32 : i32
    %c7_i32 = arith.constant 7 : i32
    %3 = arith.minsi %2, %c7_i32 : i32
    %false = arith.constant false
    %4 = vector.broadcast %false : i1 to vector<64x1xi1>
    %c0_i32_0 = arith.constant 0 : i32
    %5 = arith.addi %c0_i32_0, %3 : i32
    %6 = arith.index_cast %5 : i32 to index
    %7 = memref.load %arg2[%6] : memref<16xi32, #tpu.memory_space<smem>>
    %c0_i32_1 = arith.constant 0 : i32
    %8 = arith.addi %c0_i32_1, %3 : i32
    %9 = arith.index_cast %8 : i32 to index
    %10 = memref.load %arg3[%9] : memref<16xi32, #tpu.memory_space<smem>>
    %11 = vector.broadcast %7 : i32 to vector<64x1xi32>
    %12 = arith.cmpi sge, %0, %11 : vector<64x1xi32>
    %13 = vector.broadcast %10 : i32 to vector<64x1xi32>
    %14 = arith.cmpi slt, %0, %13 : vector<64x1xi32>
    %15 = arith.andi %12, %14 : vector<64x1xi1>
    %16 = arith.ori %4, %15 : vector<64x1xi1>
    %c8_i32 = arith.constant 8 : i32
    %17 = arith.addi %c8_i32, %3 : i32
    %18 = arith.index_cast %17 : i32 to index
    %19 = memref.load %arg2[%18] : memref<16xi32, #tpu.memory_space<smem>>
    %c8_i32_2 = arith.constant 8 : i32
    %20 = arith.addi %c8_i32_2, %3 : i32
    %21 = arith.index_cast %20 : i32 to index
    %22 = memref.load %arg3[%21] : memref<16xi32, #tpu.memory_space<smem>>
    %23 = vector.broadcast %19 : i32 to vector<64x1xi32>
    %24 = arith.cmpi sge, %0, %23 : vector<64x1xi32>
    %25 = vector.broadcast %22 : i32 to vector<64x1xi32>
    %26 = arith.cmpi slt, %0, %25 : vector<64x1xi32>
    %27 = arith.andi %24, %26 : vector<64x1xi1>
    %28 = arith.ori %16, %27 : vector<64x1xi1>
    %c0 = arith.constant 0 : index
    %c0_3 = arith.constant 0 : index
    %c0_4 = arith.constant 0 : index
    %29 = vector.load %arg4[%c0, %c0_3, %c0_4] : memref<1x64x128xf32, #tpu.memory_space<vmem>>, vector<1x64x128xf32>
    %30 = vector.shape_cast %29 : vector<1x64x128xf32> to vector<64x128xf32>
    %c0_i32_5 = arith.constant 0 : i32
    %31 = arith.sitofp %c0_i32_5 : i32 to f32
    %32 = vector.shape_cast %28 : vector<64x1xi1> to vector<64x1xi1>
    %33 = vector.broadcast %32 : vector<64x1xi1> to vector<64x128xi1>
    %34 = vector.broadcast %31 : f32 to vector<64x128xf32>
    %35 = arith.select %33, %34, %30 : vector<64x128xi1>, vector<64x128xf32>
    %c0_6 = arith.constant 0 : index
    %c0_7 = arith.constant 0 : index
    %c0_8 = arith.constant 0 : index
    %36 = vector.load %arg5[%c0_6, %c0_7, %c0_8] : memref<1x64x128xf32, #tpu.memory_space<vmem>>, vector<1x64x128xf32>
    %37 = vector.shape_cast %36 : vector<1x64x128xf32> to vector<64x128xf32>
    %38 = vector.shape_cast %35 : vector<64x128xf32> to vector<1x64x128xf32>
    tpu.vector_store %arg5[%c0_6, %c0_7, %c0_8], %38 {strides = array<i32>} : memref<1x64x128xf32, #tpu.memory_space<vmem>>, vector<1x64x128xf32>,
    return
  }
  func.func @transform_0(%arg0: i32, %arg1: i32, %arg2: memref<16xi32, #tpu.memory_space<smem>>, %arg3: memref<16xi32, #tpu.memory_space<smem>>) -> (i32, i32, i32) {
    %c0_i32 = arith.constant 0 : i32
    %c0_i32_0 = arith.constant 0 : i32
    return %arg0, %c0_i32, %arg1 : i32, i32, i32
  }
  func.func @transform_1(%arg0: i32, %arg1: i32, %arg2: memref<16xi32, #tpu.memory_space<smem>>, %arg3: memref<16xi32, #tpu.memory_space<smem>>) -> (i32, i32, i32) {
    %c0_i32 = arith.constant 0 : i32
    %c0_i32_0 = arith.constant 0 : i32
    return %arg0, %c0_i32, %arg1 : i32, i32, i32
  }
}

</mosaic_0001>

<bundles_post_ra>
// kernel: tpu_custom_call.1
= control target key start
LH: loop header
LB: loop body
LE: loop exit
PB: predicated region body
PF: predicated region fallthrough
CT: control target
= control target key end

     0   :  { %s909_s0 = inlined_call_operand.hbm [shape: s32[16], index: 0, kind: input, shape index: {}]   ;;  %s910_s2 = inlined_call_operand.hbm [shape: f32[8,64,128], index: 2, kind: input, shape index: {}]   ;;  %s911_s3 = inlined_call_operand.hbm [shape: f32[8,64,128], index: 3, kind: output, shape index: {}]   ;;  %s912_s1 = inlined_call_operand.vmem [shape: s32[16], index: 1, kind: input, shape index: {}]  }
   0x1   :  { %s463_s14 = scalar_lea.hbm %s909_s0, 16 }
   0x2   :  { %p464_p0 = scmp.ne.s32.totalorder %s909_s0, %s463_s14  ;;  %p467_p1 = scmp.lt.u32.totalorder %s463_s14, %s909_s0 }
   0x4   :  { %p469_p2 = pnand %p467_p1, %p464_p0 }
   0x6   :  { %472 = shalt.err (!%p469_p2)  }
   0x7   :  { %s601_s19 = smov [#allocation3]   ;;  %s10_s24 = sshll.u32 %s912_s1, 4  ;;  %s11_s24 = int_to_ptr.vmem [resolvable:$true] %s10_s24 }
   0x8   :  { %9 = dma.hbm_to_smem %s909_s0, 16, %s601_s19, [#allocation2] }
   0x9   :  { %s473_s25 = scalar_lea.vmem %s11_s24, 16  ;;  %p478_p4 = scmp.lt.s32.totalorder %s11_s24, %s11_s24 }
   0xa   :  { %p474_p3 = scmp.ne.s32.totalorder %s11_s24, %s473_s25  ;;  %p479_p5 = scmp.lt.s32.totalorder %s473_s25, %s473_s25 }
   0xc   :  { %p480_p6 = por %p479_p5, %p478_p4 }
   0xe   :  { %p481_p7 = pnand %p480_p6, %p474_p3 }
  0x10   :  { %484 = shalt.err (!%p481_p7)  }
  0x11   :  { %s602_s26 = smov [#allocation4]  }
  0x12   :  { %13 = dma.vmem_to_smem %s11_s24, 16, %s602_s26, [#allocation2] }
  0x13   :  { %567 = dma.done.wait [#allocation2], 32 }
  0x14   :  { %568 = vsyncadd [#allocation2], 4294967264 }
  0x15   :  { %15 = sfence }
  0x16   :  { %16 = vsyncpa [#allocation6], 0 }
  0x17   :  { %18 = vsyncpa [#allocation6 + $0x1], 0 }
  0x18   :  { %19 = vsyncpa [#allocation7], 0 }
  0x19   :  { %21 = vsyncpa [#allocation7 + $0x1], 0  ;;  %s644_s0 = smov 0   ;;  %s646_s1 = smov 0  }
  0x1a   :  { %s648_s27 = smov 0   ;;  %s650_s28 = smov 0  }
  0x1b   :  { %s652_s29 = smov 0   ;;  %s654_s30 = smov 0  }
  0x1c LB: > { %s378_s4 = sadd.s32 4294967295, %s599_s30   ;;  %s379_s5 = sadd.s32 4294967294, %s599_s30   ;;  %s599_s30 = sphi %s654_s30, %s27_s30   ;;  %s595_s29 = sphi %s652_s29, %s930_s29   ;;  %s591_s28 = sphi %s650_s28, %s929_s28   ;;  %s587_s27 = sphi %s648_s27, %s928_s27   ;;  %s583_s1 = sphi %s646_s1, %s927_s1   ;;  %s579_s0 = sphi %s644_s0, %s926_s0  }
  0x1d   : > { %s39_s6 = sadd.s32 1, %s595_s29  ;;  %s48_s7 = sadd.s32 1, %s587_s27 }
  0x1e   : > { %p41_p8 = scmp.ge.s32.totalorder %s39_s6, 8  ;;  %p55_p9 = scmp.ne.s32.totalorder %s587_s27, %s583_s1 }
  0x1f   : > { %p56_p10 = scmp.eq.s32.totalorder %s599_s30, 0  ;;  %p61_p11 = scmp.ne.s32.totalorder %s583_s1, %s579_s0 }
  0x20   : > { %s932_s6 = smov (%p41_p8, %s39_s6), 0  ;;  %p62_p13 = scmp.eq.s32.totalorder %s378_s4, 0 }
  0x21   : > { %p685_p12 = por %p56_p10, %p55_p9  ;;  %s43_s9 = ssub.s32 %s595_s29, %s932_s6 }
  0x22   : > { %p87_p0 = scmp.eq.s32.totalorder %s378_s4, 7  ;;  %p46_p1 = scmp.eq.s32.totalorder %s43_s9, 0 }
  0x23   : > { %p691_p2 = por %p62_p13, %p61_p11  ;;  %p93_p4 = scmp.eq.s32.totalorder %s379_s5, 7 }
  0x24   : > { %p695_p3 = por %p87_p0, %p55_p9  ;;  %p407_p6 = scmp.lt.s32.totalorder %s599_s30, 8 }
  0x25   : > { %s700_s12 = scalar_select %p46_p1, %s587_s27, %s48_s7  }
  0x26   : > { %s916_s11 = scalar_select %p695_p3, 1, 0 }
  0x27   : > { %p702_p5 = por %p93_p4, %p61_p11  ;;  %s113_s14 = sand.u32 1, %s587_s27  }
  0x28   : > { %s382_s15 = sshll.u32 %s113_s14, 6  ;;  %s393_s16 = sshll.u32 %s595_s29, 10 }
  0x29   : > { %s917_s13 = scalar_select %p702_p5, 1, 0 }
  0x2a   : > { %s712_s19 = scalar_lea.hbm %s910_s2, %s393_s16  ;;  %s117_s20 = scalar_lea.vmem [#allocation5], %s382_s15 }
  0x2b   : > { %s125_s21 = sshll.u32 %s117_s20, 4  ;;  %p718_p7 = pnand %p407_p6, %p685_p12  ;;  %s714_s21 = int_to_ptr.vmem [resolvable:$true] %s125_s21 }
  0x2c   : > { %s723_s23 = scalar_lea.sflag [#allocation6], %s113_s14  ;;  %s485_s24 = scalar_lea.hbm %s712_s19, 1024 }
  0x2d   : > { %p486_p9 = scmp.ne.s32.totalorder %s712_s19, %s485_s24  ;;  %p487_p10 = pneg %p718_p7 }
  0x2e   : > { %s490_s4 = scalar_lea.hbm %s910_s2, 8192  ;;  %p491_p12 = scmp.lt.u32.totalorder %s712_s19, %s910_s2 }
  0x2f   : > { %p488_p11 = pnand %p487_p10, %p486_p9  ;;  %p492_p0 = scmp.lt.u32.totalorder %s490_s4, %s485_s24 }
  0x30   : > { %p494_p4 = scmp.lt.u32.totalorder %s485_s24, %s712_s19 }
  0x31   : > { %p489_p13 = pneg %p488_p11  ;;  %p493_p1 = por %p492_p0, %p491_p12 }
  0x33   : > { %p495_p6 = por %p494_p4, %p493_p1 }
  0x35   : > { %p496_p8 = pnand %p495_p6, %p489_p13 }
  0x37   : > { %499 = shalt.err (!%p496_p8)
}
  0x38   : > { %s500_s8 = scalar_lea.vmem %s714_s21, 1024  ;;  %s603_s9 = smov [#allocation5]  }
  0x39   : > { %p501_p9 = scmp.ne.s32.totalorder %s714_s21, %s500_s8  ;;  %s505_s14 = sshll.u32 %s603_s9, 4  ;;  %s506_s14 = int_to_ptr.vmem [resolvable:$false] %s505_s14 }
  0x3a   : > { %s507_s15 = scalar_lea.vmem %s506_s14, 2048  ;;  %p508_p3 = scmp.lt.s32.totalorder %s714_s21, %s506_s14 }
  0x3b   : > { %p503_p11 = pnand %p501_p9, %p487_p10  ;;  %p509_p12 = scmp.lt.s32.totalorder %s507_s15, %s500_s8 }
  0x3d   : > { %p504_p5 = pneg %p503_p11  ;;  %p510_p0 = por %p509_p12, %p508_p3 }
  0x3f   : > { %p511_p1 = pnand %p510_p0, %p504_p5 }
  0x41   : > { %514 = shalt.err (!%p511_p1)
}
  0x42   : > { %s604_s16 = smov 128   ;;  %s605_s17 = smov 8  }
  0x43   : > { %402 = dma.hbm_to_vmem [thread:$0]  (!%p718_p7), %s712_s19, 1024, %s714_s21, %s723_s23, %s604_s16, %s604_s16, %s605_s17  }
  0x44   : > { %p133_p8 = scmp.lt.s32.totalorder %s599_s30, 9  ;;  %p919_p10 = scmp.ge.s32.totalorder %s599_s30, 1 }
  0x46   : > { %p134_p13 = pnand %p919_p10, %p133_p8 }
  0x47   : > { %s755_s18 = sand.u32 (!%p134_p13), 1, %s583_s1  }
  0x48   : > { %137 = sbr.rel (%p134_p13) target bundleno = 133 (0x85), region = 24  ;;  %s386_s20 = sshll.u32 (!%p134_p13), %s755_s18, 6 }
  0x49   : > { %s140_s24 = scalar_lea.sflag (!%p134_p13), [#allocation6], %s755_s18  ;;  %s761_s25 = scalar_lea.vmem (!%p134_p13), [#allocation5], %s386_s20 }
  0x4f   : > { %570 = dma.done.wait (%p691_p2), %s140_s24, 1024  }
  0x50   : > { %572 = vsyncadd (%p691_p2), %s140_s24, 4294966272  ;;  %v162_v0 = vlaneseq  ;;  %p171_p3 = scmp.lt.s32.totalorder %s591_s28, 7  ;;  %v238_v9 = vld [vmem:[%s761_s25] sm:$0xff]  ;;  %v239_v12 = vld [vmem:[%s761_s25 + $0x8] sm:$0xff]  ;;  %s812_s10 = scalar_lea.vmem [#allocation8], %s386_s20 }
  0x51   : > { %v240_v16 = vld [vmem:[%s761_s25 + $0x10] sm:$0xff]  ;;  %v241_v19 = vld [vmem:[%s761_s25 + $0x18] sm:$0xff]  ;;  %v242_v22 = vld [vmem:[%s761_s25 + $0x20] sm:$0xff]  ;;  %s293_s5 = sshll.u32 %s812_s10, 4  ;;  %s394_s7 = sshll.u32 %s591_s28, 10  ;;  %s854_s5 = int_to_ptr.vmem [resolvable:$true] %s293_s5 }
  0x52   : > { %s172_s19 = scalar_select %p171_p3, %s591_s28, 7  ;;  %v769_v1 = vshrl.u32 %v162_v0, 7  ;;  %v243_v25 = vld [vmem:[%s761_s25 + $0x28] sm:$0xff]  ;;  %v244_v27 = vld [vmem:[%s761_s25 + $0x30] sm:$0xff]  ;;  %v245_v29 = vld [vmem:[%s761_s25 + $0x38] sm:$0xff] }
  0x53   : > { %s860_s14 = scalar_lea.hbm %s911_s3, %s394_s7  ;;  %s279_s28 = scalar_lea.sflag [#allocation7], %s755_s18 }
  0x54   : > { %s173_s21 = sld [smem:[#allocation3 + %s172_s19]]  ;;  %s201_s23 = sadd.s32 8, %s172_s19  ;;  %v164_v2 = vadd.s32 8, %v769_v1  ;;  %v165_v5 = vadd.s32 16, %v769_v1  ;;  %v166_v11 = vadd.s32 24, %v769_v1  ;;  %v167_v14 = vadd.s32 32, %v769_v1 }
  0x55   : > { %s174_s22 = sld [smem:[#allocation4 + %s172_s19]]  ;;  %v168_v17 = vadd.s32 40, %v769_v1  ;;  %v169_v20 = vadd.s32 48, %v769_v1  ;;  %v170_v23 = vadd.s32 56, %v769_v1  ;;  %s515_s15 = scalar_lea.vmem %s854_s5, 1024 }
  0x56   : > { %s202_s26 = sld [smem:[#allocation3 + %s201_s23]]  ;;  %p516_p2 = scmp.ne.s32.totalorder %s854_s5, %s515_s15 }
  0x57   : > { %s203_s4 = sld [smem:[#allocation4 + %s201_s23]]  ;;  %p924_p5 = scmp.ne.s32.totalorder %s916_s11, 0 }
  0x58   : > { %s606_s16 = smov [#allocation8]  }
  0x59   : > { %p517_p7 = pnand %p516_p2, %p924_p5  ;;  %s519_s17 = sshll.u32 %s606_s16, 4  ;;  %s520_s17 = int_to_ptr.vmem [resolvable:$false] %s519_s17 }
  0x5a   : > { %v772_v3 = vstv %s173_s21  ;;  %s521_s20 = scalar_lea.vmem %s520_s17, 2048  ;;  %p522_p6 = scmp.lt.s32.totalorder %s854_s5, %s520_s17 }
  0x5b   : > { %v774_v4 = vstv %s174_s22  ;;  %vm176_vm0 = vcmp.ge.s32.totalorder %v769_v1, %v772_v3  ;;  %vm177_vm2 = vcmp.ge.s32.totalorder %v164_v2, %v772_v3  ;;  %vm178_vm12 = vcmp.ge.s32.totalorder %v165_v5, %v772_v3  ;;  %p518_p4 = pneg %p517_p7  ;;  %p523_p9 = scmp.lt.s32.totalorder %s521_s20, %s515_s15 }
  0x5c   : > { %vm185_vm1 = vcmp.lt.s32.totalorder %v769_v1, %v774_v4  ;;  %vm186_vm3 = vcmp.lt.s32.totalorder %v164_v2, %v774_v4  ;;  %v787_v7 = vstv %s202_s26  ;;  %vm187_vm13 = vcmp.lt.s32.totalorder %v165_v5, %v774_v4 }
  0x5d   : > { %vm783_vm4 = vmand %vm176_vm0, %vm185_vm1  ;;  %v789_v8 = vstv %s203_s4  ;;  %vm205_vm5 = vcmp.ge.s32.totalorder %v769_v1, %v787_v7  ;;  %vm206_vm8 = vcmp.ge.s32.totalorder %v164_v2, %v787_v7  ;;  %vm207_vm15 = vcmp.ge.s32.totalorder %v165_v5, %v787_v7  ;;  %p524_p11 = por %p523_p9, %p522_p6 }
  0x5e   : > { %vm214_vm6 = vcmp.lt.s32.totalorder %v769_v1, %v789_v8  ;;  %vm796_vm7 = vmand %vm177_vm2, %vm186_vm3  ;;  %vm215_vm9 = vcmp.lt.s32.totalorder %v164_v2, %v789_v8  ;;  %vm216_vm0 = vcmp.lt.s32.totalorder %v165_v5, %v789_v8  ;;  %vm179_vm3 = vcmp.ge.s32.totalorder %v166_v11, %v772_v3 }
  0x5f   : > { %vm222_vm10 = vmand %vm205_vm5, %vm214_vm6  ;;  %vm208_vm6 = vcmp.ge.s32.totalorder %v166_v11, %v787_v7  ;;  %p525_p12 = pnand %p524_p11, %p518_p4 }
  0x60   : > { %vm230_vm11 = vmor %vm783_vm4, %vm222_vm10  ;;  %vm188_vm4 = vcmp.lt.s32.totalorder %v166_v11, %v774_v4  ;;  %vm180_vm10 = vcmp.ge.s32.totalorder %v167_v14, %v772_v3 }
  0x61   : > { %v262_v13 = vsel %vm230_vm11, 0.0, %v238_v9  ;;  %vm223_vm14 = vmand %vm206_vm8, %vm215_vm9  ;;  %vm217_vm8 = vcmp.lt.s32.totalorder %v166_v11, %v789_v8  ;;  %vm189_vm11 = vcmp.lt.s32.totalorder %v167_v14, %v774_v4 }
  0x62   : > { %270 = vst [vmem:[%s812_s10] sm:$0xff] %v262_v13  ;;  %vm231_vm1 = vmor %vm796_vm7, %vm223_vm14  ;;  %vm218_vm14 = vcmp.lt.s32.totalorder %v167_v14, %v789_v8 }
  0x63   : > { %v263_v15 = vsel %vm231_vm1, 0.0, %v239_v12  ;;  %vm195_vm2 = vmand %vm178_vm12, %vm187_vm13  ;;  %vm209_vm13 = vcmp.ge.s32.totalorder %v167_v14, %v787_v7  ;;  %vm181_vm1 = vcmp.ge.s32.totalorder %v168_v17, %v772_v3 }
  0x64   : > { %271 = vst [vmem:[%s812_s10 + $0x8] sm:$0xff] %v263_v15  ;;  %vm224_vm5 = vmand %vm207_vm15, %vm216_vm0 }
  0x65   : > { %vm232_vm9 = vmor %vm195_vm2, %vm224_vm5  ;;  %vm190_vm2 = vcmp.lt.s32.totalorder %v168_v17, %v774_v4  ;;  %vm219_vm5 = vcmp.lt.s32.totalorder %v168_v17, %v789_v8 }
  0x66   : > { %v264_v18 = vsel %vm232_vm9, 0.0, %v240_v16  ;;  %vm196_vm7 = vmand %vm179_vm3, %vm188_vm4  ;;  %vm210_vm4 = vcmp.ge.s32.totalorder %v168_v17, %v787_v7  ;;  %vm182_vm9 = vcmp.ge.s32.totalorder %v169_v20, %v772_v3 }
  0x67   : > { %272 = vst [vmem:[%s812_s10 + $0x10] sm:$0xff] %v264_v18  ;;  %vm225_vm12 = vmand %vm208_vm6, %vm217_vm8 }
  0x68   : > { %vm233_vm15 = vmor %vm196_vm7, %vm225_vm12  ;;  %vm191_vm7 = vcmp.lt.s32.totalorder %v169_v20, %v774_v4  ;;  %vm220_vm12 = vcmp.lt.s32.totalorder %v169_v20, %v789_v8 }
  0x69   : > { %v265_v21 = vsel %vm233_vm15, 0.0, %v241_v19  ;;  %vm197_vm0 = vmand %vm180_vm10, %vm189_vm11  ;;  %vm211_vm11 = vcmp.ge.s32.totalorder %v169_v20, %v787_v7  ;;  %vm183_vm15 = vcmp.ge.s32.totalorder %v170_v23, %v772_v3 }
  0x6a   : > { %273 = vst [vmem:[%s812_s10 + $0x18] sm:$0xff] %v265_v21  ;;  %vm226_vm3 = vmand %vm209_vm13, %vm218_vm14 }
  0x6b   : > { %vm234_vm6 = vmor %vm197_vm0, %vm226_vm3  ;;  %vm192_vm0 = vcmp.lt.s32.totalorder %v170_v23, %v774_v4  ;;  %vm221_vm3 = vcmp.lt.s32.totalorder %v170_v23, %v789_v8 }
  0x6c   : > { %v266_v24 = vsel %vm234_vm6, 0.0, %v242_v22  ;;  %vm198_vm8 = vmand %vm181_vm1, %vm190_vm2  ;;  %vm212_vm2 = vcmp.ge.s32.totalorder %v170_v23, %v787_v7 }
  0x6d   : > { %274 = vst [vmem:[%s812_s10 + $0x20] sm:$0xff] %v266_v24  ;;  %vm227_vm10 = vmand %vm210_vm4, %vm219_vm5 }
  0x6e   : > { %vm235_vm13 = vmor %vm198_vm8, %vm227_vm10 }
  0x6f   : > { %v267_v26 = vsel %vm235_vm13, 0.0, %v243_v25  ;;  %vm199_vm14 = vmand %vm182_vm9, %vm191_vm7 }
  0x70   : > { %275 = vst [vmem:[%s812_s10 + $0x28] sm:$0xff] %v267_v26  ;;  %vm228_vm1 = vmand %vm211_vm11, %vm220_vm12 }
  0x71   : > { %vm236_vm4 = vmor %vm199_vm14, %vm228_vm1 }
  0x72   : > { %v268_v28 = vsel %vm236_vm4, 0.0, %v244_v27  ;;  %vm200_vm5 = vmand %vm183_vm15, %vm192_vm0 }
  0x73   : > { %276 = vst [vmem:[%s812_s10 + $0x30] sm:$0xff] %v268_v28  ;;  %vm229_vm6 = vmand %vm212_vm2, %vm221_vm3 }
  0x74   : > { %vm237_vm8 = vmor %vm200_vm5, %vm229_vm6 }
  0x75   : > { %v269_v30 = vsel %vm237_vm8, 0.0, %v245_v29 }
  0x76   : > { %277 = vst [vmem:[%s812_s10 + $0x38] sm:$0xff] %v269_v30 }
  0x77   : > { %528 = shalt.err (!%p525_p12)
}
  0x78   : > { %s529_s24 = scalar_lea.hbm %s860_s14, 1024  ;;  %s533_s21 = scalar_lea.hbm %s911_s3, 8192 }
  0x79   : > { %p530_p0 = scmp.ne.s32.totalorder %s860_s14, %s529_s24  ;;  %p534_p10 = scmp.lt.u32.totalorder %s860_s14, %s911_s3 }
  0x7a   : > { %p535_p13 = scmp.lt.u32.totalorder %s533_s21, %s529_s24  ;;  %p537_p2 = scmp.lt.u32.totalorder %s529_s24, %s860_s14 }
  0x7b   : > { %p531_p1 = pnand %p530_p0, %p924_p5 }
  0x7c   : > { %p536_p3 = por %p535_p13, %p534_p10 }
  0x7d   : > { %p532_p8 = pneg %p531_p1 }
  0x7e   : > { %p538_p7 = por %p537_p2, %p536_p3 }
  0x80   : > { %p539_p4 = pnand %p538_p7, %p532_p8 }
  0x82   : > { %542 = shalt.err (!%p539_p4)
}
  0x83   : > { %s607_s26 = smov 128   ;;  %s608_s4 = smov 8  }
  0x84   : > { %397 = dma.vmem_to_hbm [thread:$0]  (%p924_p5), %s854_s5, 1024, %s860_s14, %s279_s28, %s607_s26, %s607_s26, %s608_s4  }
  0x85 PF: > { %p408_p6 = scmp.ge.s32.totalorder %s599_s30, 2  ;;  %s308_s10 = sand.u32 1, %s579_s0  }
  0x86   : > { %p925_p9 = scmp.ne.s32.totalorder %s917_s13, 0  ;;  %s309_s7 = scalar_lea.sflag [#allocation7], %s308_s10 }
  0x88   : > { %p404_p11 = pnand %p408_p6, %p925_p9 }
  0x8a   : > { %574 = dma.done.wait (!%p404_p11), %s309_s7, 1024  }
  0x8b   : > { %576 = vsyncadd (!%p404_p11), %s309_s7, 4294966272  ;;  %s27_s30 = sadd.s32 1, %s599_s30   ;;  %s926_s0 = smov %s583_s1 }
  0x8c   : > { %p24_p12 = scmp.ge.s32.totalorder %s27_s30, 10   ;;  %s927_s1 = smov %s587_s27 }
  0x8d   : > { %s928_s27 = smov %s700_s12  ;;  %s929_s28 = smov %s595_s29 }
  0x8e   : > { %s930_s29 = smov %s932_s6  ;;  %26 = sbr.rel (!%p24_p12) target bundleno = 28 (0x1c), region = 69 }
  0x95   :  { %314 = vsyncpa [#allocation6], 1 }
  0x96   :  { %316 = vsyncpa [#allocation6 + $0x1], 1 }
  0x97   :  { %317 = vsyncpa [#allocation7], 1 }
  0x98   :  { %319 = vsyncpa [#allocation7 + $0x1], 1 }

</bundles_post_ra>
